<compile_context>
chip_gen: v6e
topology: v6e:2x2x1
jax: 0.10.0
libtpu: 0.0.40
codegen_flags: <defaults>
</compile_context>

<pallas_src>
import functools

import jax
import jax.numpy as jnp
from jax.experimental import pallas as pl
from jax.experimental.pallas import tpu as pltpu

EPS = 1e-5


def _banded_conv_weights(w_hwio, W):
    """(3, 3, Cin, Cout) HWIO -> (3*W*Cin, W*Cout) banded im2col weight matrix.

    Row index is (dy, xcol, ci) (ci fastest); it pairs with an activation slab
    whose band dy holds input row (h + dy - 1).  Column index is (w, co)
    (co fastest), i.e. the lane-dense output layout.  Taps that would read a
    padded column are simply absent (zero rows), so no W-padding is needed.
    """
    kh, kw, cin, cout = w_hwio.shape
    B = jnp.zeros((kh, W, cin, W, cout), w_hwio.dtype)
    for dx in range(kw):
        w_lo = max(0, 1 - dx)          # xcol = w + dx - 1 must lie in [0, W)
        w_hi = min(W, W + 1 - dx)
        wi = jnp.arange(w_lo, w_hi)
        B = B.at[:, wi + dx - 1, :, wi, :].set(w_hwio[:, dx, :, :][None])
    return B.reshape(kh * W * cin, W * cout)


def _stack_rows(rows):
    """Stack a list of (1, L) rows into (len(rows), L) via broadcast+select
    (no sub-tile sublane concatenation inside the kernel)."""
    n, L = len(rows), rows[0].shape[-1]
    rid = jax.lax.broadcasted_iota(jnp.int32, (n, L), 0)
    out = rows[0]
    for i in range(1, n):
        out = jnp.where(rid == i, rows[i], out)
    return out


def _make_block_kernel(WC):
    def scale_shift(mean, ex2, gamma, beta):
        var = ex2 - mean * mean                        # one-pass variance, f32
        scale = gamma * jax.lax.rsqrt(var + EPS)
        return scale, beta - mean * scale

    def kernel(a1_ref, ws1_ref, w2_ref, bn_ref, fold_ref, shift_ref, out_ref):
        # ---- stage 1: conv1 || conv_res as ONE (NH, K1) @ (K1, 2*WC) matmul
        s1 = jnp.dot(a1_ref[...], ws1_ref[...],
                     preferred_element_type=jnp.float32)         # (NH, 2*WC)
        sum1 = jnp.sum(s1, axis=0, keepdims=True)                # (1, 2*WC)
        ssq1 = jnp.sum(s1 * s1, axis=0, keepdims=True)           # (1, 2*WC)

        # Batched BN statistics: one fold matmul for all four stage-1 rows.
        stats1 = _stack_rows([sum1[:, :WC], ssq1[:, :WC],
                              sum1[:, WC:], ssq1[:, WC:]])       # (4, WC)
        ch1 = jnp.dot(stats1, fold_ref[...],
                      preferred_element_type=jnp.float32)        # (4, WC)
        sc1, sh1 = scale_shift(ch1[0:1], ch1[1:2], bn_ref[0:1, :], bn_ref[1:2, :])
        scr, shr = scale_shift(ch1[2:3], ch1[3:4], bn_ref[2:3, :], bn_ref[3:4, :])

        y1 = jnp.maximum(s1[:, :WC] * sc1 + sh1, 0.0)            # (NH, WC)
        res = s1[:, WC:] * scr + shr                             # (NH, WC)

        # ---- stage 2: conv2 = one (NH, WC) @ (WC, 3*WC) matmul over the
        # three dy-bands, then row-shift the dy=0 / dy=2 band results with
        # the tiny boundary-masked shift matrices (y1 never leaves vregs).
        p = jnp.dot(y1, w2_ref[...],
                    preferred_element_type=jnp.float32)          # (NH, 3*WC)
        y2_pre = (jnp.dot(shift_ref[0], p[:, :WC],
                          preferred_element_type=jnp.float32)    # row h-1 band
                  + p[:, WC:2 * WC]                              # row h   band
                  + jnp.dot(shift_ref[1], p[:, 2 * WC:],
                            preferred_element_type=jnp.float32))  # row h+1 band

        stats2 = _stack_rows([jnp.sum(y2_pre, axis=0, keepdims=True),
                              jnp.sum(y2_pre * y2_pre, axis=0, keepdims=True)])
        ch2 = jnp.dot(stats2, fold_ref[...],
                      preferred_element_type=jnp.float32)        # (2, WC)
        sc2, sh2 = scale_shift(ch2[0:1], ch2[1:2], bn_ref[4:5, :], bn_ref[5:6, :])

        out_ref[...] = jnp.maximum(y2_pre * sc2 + sh2 + res, 0.0)

    return kernel


def residual_block_forward(x_nchw, params):
    """Forward pass of Residual_Block (s=1, p=1).  Input/output NCHW like PyTorch."""
    x = jnp.transpose(x_nchw, (0, 2, 3, 1)).astype(jnp.float32)      # NCHW->NHWC
    N, H, W, Cin = x.shape
    Cout = params["w1"].shape[-1]
    WC = W * Cout
    NH = N * H
    K1 = 3 * W * Cin

    # im2col slab for x (built XLA-side, 24 KiB): band dy holds input row
    # h+dy-1; slab lane layout (dy, xcol, ci) with ci fastest.
    x2 = x.reshape(N, H, W * Cin)
    xp = jnp.pad(x2, ((0, 0), (1, 1), (0, 0)))
    a1 = jnp.concatenate([xp[:, dy:H + dy, :] for dy in range(3)],
                         axis=-1).reshape(NH, K1)

    # Banded conv weights; conv1 and the residual conv share the LHS, so their
    # weights are concatenated column-wise into one (K1, 2*WC) matrix.
    w1b = _banded_conv_weights(params["w1"].astype(jnp.float32), W)       # (K1, WC)
    wrb = _banded_conv_weights(params["w_res"].astype(jnp.float32), W)    # (K1, WC)
    ws1 = jnp.concatenate([w1b, wrb], axis=1)                             # (K1, 2*WC)
    # conv2: the three dy-bands laid side by side -> one (WC, 3*WC) matmul.
    w2b = _banded_conv_weights(params["w2"].astype(jnp.float32), W)       # (3*WC, WC)
    w2w = jnp.concatenate([w2b[dy * WC:(dy + 1) * WC] for dy in range(3)],
                          axis=1)                                         # (WC, 3*WC)

    # BN affine params.  Conv biases are dropped: BN batch-mean subtraction
    # cancels them exactly.
    bn = jnp.stack([
        jnp.tile(params["g1"], W), jnp.tile(params["beta1"], W),
        jnp.tile(params["g_res"], W), jnp.tile(params["beta_res"], W),
        jnp.tile(params["g2"], W), jnp.tile(params["beta2"], W),
    ]).astype(jnp.float32)                                                # (6, WC)

    # fold[i, j] = 1/(N*H*W) iff lanes i and j hold the same channel
    # (lane = w*Cout + co): one small matmul turns per-lane sums into
    # per-channel means already broadcast to every lane.
    lane = jnp.arange(WC)
    fold = ((lane[:, None] % Cout) == (lane[None, :] % Cout)).astype(
        jnp.float32) / float(N * H * W)                                   # (WC, WC)

    # Boundary-masked row-shift matrices for the dy=0 / dy=2 conv2 bands:
    # shifts[0][r, r-1] = 1 unless r is the first row of an image,
    # shifts[1][r, r+1] = 1 unless r is the last row of an image.
    row = jnp.arange(NH)[:, None]
    col = jnp.arange(NH)[None, :]
    s_up = ((col == row - 1) & (row % H != 0)).astype(jnp.float32)
    s_dn = ((col == row + 1) & (row % H != H - 1)).astype(jnp.float32)
    shifts = jnp.stack([s_up, s_dn])                                      # (2, NH, NH)

    flops = 2 * (NH * K1 * 2 * WC + NH * WC * 3 * WC + 2 * NH * NH * WC
                 + 6 * WC * WC) + 12 * NH * WC
    bytes_accessed = 4 * (a1.size + ws1.size + w2w.size + bn.size + fold.size
                          + shifts.size + NH * WC)

    kernel = _make_block_kernel(WC)
    out_ld = pl.pallas_call(
        kernel,
        out_shape=jax.ShapeDtypeStruct((NH, WC), jnp.float32),    # lane-dense
        in_specs=[pl.BlockSpec(memory_space=pltpu.MemorySpace.VMEM)] * 6,
        out_specs=pl.BlockSpec(memory_space=pltpu.MemorySpace.VMEM),
        cost_estimate=pl.CostEstimate(flops=flops, transcendentals=3 * WC,
                                      bytes_accessed=bytes_accessed),
    )(a1, ws1, w2w, bn, fold, shifts)

    out = out_ld.reshape(N, H, W, Cout)                           # (NH,WC)->NHWC
    return jnp.transpose(out, (0, 3, 1, 2))                       # NHWC->NCHW


def init_params(key, cin, cout):
    ks = jax.random.split(key, 6)
    return {
        "w1": 0.1 * jax.random.normal(ks[0], (3, 3, cin, cout), jnp.float32),
        "b1": 0.05 * jax.random.normal(ks[1], (cout,), jnp.float32),
        "g1": jnp.ones((cout,), jnp.float32),
        "beta1": jnp.zeros((cout,), jnp.float32),
        "w2": 0.1 * jax.random.normal(ks[2], (3, 3, cout, cout), jnp.float32),
        "b2": 0.05 * jax.random.normal(ks[3], (cout,), jnp.float32),
        "g2": 1.0 + 0.1 * jax.random.normal(ks[4], (cout,), jnp.float32),
        "beta2": jnp.zeros((cout,), jnp.float32),
        "w_res": 0.1 * jax.random.normal(ks[5], (3, 3, cin, cout), jnp.float32),
        "b_res": jnp.zeros((cout,), jnp.float32),
        "g_res": jnp.ones((cout,), jnp.float32),
        "beta_res": jnp.zeros((cout,), jnp.float32),
    }


def _reference_block(x_nchw, params):
    """Pure-JAX reference for a correctness sanity check."""
    x = jnp.transpose(x_nchw, (0, 2, 3, 1)).astype(jnp.float32)

    def conv_bn(t, w, b, g, be, relu):
        y = jax.lax.conv_general_dilated(
            t, w, window_strides=(1, 1), padding="SAME",
            dimension_numbers=("NHWC", "HWIO", "NHWC")) + b
        m = jnp.mean(y, axis=(0, 1, 2), keepdims=True)
        v = jnp.mean((y - m) ** 2, axis=(0, 1, 2), keepdims=True)
        y = (y - m) / jnp.sqrt(v + EPS) * g + be
        return jnp.maximum(y, 0.0) if relu else y

    y1 = conv_bn(x, params["w1"], params["b1"], params["g1"], params["beta1"], True)
    y2 = conv_bn(y1, params["w2"], params["b2"], params["g2"], params["beta2"], False)
    r = conv_bn(x, params["w_res"], params["b_res"], params["g_res"],
                params["beta_res"], False)
    out = jnp.maximum(y2 + r, 0.0)
    return jnp.transpose(out, (0, 3, 1, 2))


if __name__ == "__main__":
    key = jax.random.PRNGKey(0)
    k_x, k_p = jax.random.split(key)

    N, Cin, Cout, H, W = 2, 4, 8, 16, 16
    x = jax.random.normal(k_x, (N, Cin, H, W), jnp.float32)   # NCHW, like PyTorch
    params = init_params(k_p, Cin, Cout)

    out = jax.jit(functools.partial(residual_block_forward, params=params))(x)
    out = jax.block_until_ready(out)

    ref = _reference_block(x, params)
    assert out.shape == (N, Cout, H, W)
    assert bool(jnp.allclose(out, ref, atol=1e-3, rtol=1e-3)), "mismatch vs reference"

    print("KERNEL_OK")
</pallas_src>

<mosaic_0001>
module attributes {stable_mosaic.version = 11 : i64} {
  func.func @kernel(%arg0: memref<32x192xf32, #tpu.memory_space<vmem>>, %arg1: memref<192x256xf32, #tpu.memory_space<vmem>>, %arg2: memref<128x384xf32, #tpu.memory_space<vmem>>, %arg3: memref<6x128xf32, #tpu.memory_space<vmem>>, %arg4: memref<128x128xf32, #tpu.memory_space<vmem>>, %arg5: memref<2x32x32xf32, #tpu.memory_space<vmem>>, %arg6: memref<32x128xf32, #tpu.memory_space<vmem>>) attributes {dimension_semantics = [], scalar_prefetch = 0 : i64, scratch_operands = 0 : i64, tpu.core_type = #tpu.core_type<tc>} {
    %c0 = arith.constant 0 : index
    %c0_0 = arith.constant 0 : index
    %0 = vector.load %arg0[%c0, %c0_0] : memref<32x192xf32, #tpu.memory_space<vmem>>, vector<32x192xf32>
    %c0_1 = arith.constant 0 : index
    %c0_2 = arith.constant 0 : index
    %1 = vector.load %arg1[%c0_1, %c0_2] : memref<192x256xf32, #tpu.memory_space<vmem>>, vector<192x256xf32>
    %cst = arith.constant dense<0.000000e+00> : vector<32x256xf32>
    %2 = tpu.matmul %0, %1, %cst {dimension_numbers = #tpu.dot_dimension_numbers<[1], [0], [0], [1], [0, 0, 1, 1], [], []>} : vector<32x192xf32>, vector<192x256xf32>, vector<32x256xf32> -> vector<32x256xf32>
    %cst_3 = arith.constant dense<0.000000e+00> : vector<256xf32>
    %3 = vector.multi_reduction <add>, %2, %cst_3 [0] : vector<32x256xf32> to vector<256xf32>
    %4 = vector.shape_cast %3 : vector<256xf32> to vector<1x256xf32>
    %5 = arith.mulf %2, %2 : vector<32x256xf32>
    %cst_4 = arith.constant dense<0.000000e+00> : vector<256xf32>
    %6 = vector.multi_reduction <add>, %5, %cst_4 [0] : vector<32x256xf32> to vector<256xf32>
    %7 = vector.shape_cast %6 : vector<256xf32> to vector<1x256xf32>
    %8 = vector.extract_strided_slice %4 {offsets = [0, 0], sizes = [1, 128], strides = [1, 1]} : vector<1x256xf32> to vector<1x128xf32>
    %9 = vector.extract_strided_slice %7 {offsets = [0, 0], sizes = [1, 128], strides = [1, 1]} : vector<1x256xf32> to vector<1x128xf32>
    %10 = vector.extract_strided_slice %4 {offsets = [0, 128], sizes = [1, 128], strides = [1, 1]} : vector<1x256xf32> to vector<1x128xf32>
    %11 = vector.extract_strided_slice %7 {offsets = [0, 128], sizes = [1, 128], strides = [1, 1]} : vector<1x256xf32> to vector<1x128xf32>
    %12 = tpu.iota {dimensions = array<i32: 0>} : vector<4x128xi32>
    %c1_i32 = arith.constant 1 : i32
    %13 = vector.broadcast %c1_i32 : i32 to vector<4x128xi32>
    %14 = arith.cmpi eq, %12, %13 : vector<4x128xi32>
    %15 = vector.shape_cast %9 : vector<1x128xf32> to vector<1x128xf32>
    %16 = vector.broadcast %15 : vector<1x128xf32> to vector<4x128xf32>
    %17 = vector.shape_cast %8 : vector<1x128xf32> to vector<1x128xf32>
    %18 = vector.broadcast %17 : vector<1x128xf32> to vector<4x128xf32>
    %19 = arith.select %14, %16, %18 : vector<4x128xi1>, vector<4x128xf32>
    %c2_i32 = arith.constant 2 : i32
    %20 = vector.broadcast %c2_i32 : i32 to vector<4x128xi32>
    %21 = arith.cmpi eq, %12, %20 : vector<4x128xi32>
    %22 = vector.shape_cast %10 : vector<1x128xf32> to vector<1x128xf32>
    %23 = vector.broadcast %22 : vector<1x128xf32> to vector<4x128xf32>
    %24 = arith.select %21, %23, %19 : vector<4x128xi1>, vector<4x128xf32>
    %c3_i32 = arith.constant 3 : i32
    %25 = vector.broadcast %c3_i32 : i32 to vector<4x128xi32>
    %26 = arith.cmpi eq, %12, %25 : vector<4x128xi32>
    %27 = vector.shape_cast %11 : vector<1x128xf32> to vector<1x128xf32>
    %28 = vector.broadcast %27 : vector<1x128xf32> to vector<4x128xf32>
    %29 = arith.select %26, %28, %24 : vector<4x128xi1>, vector<4x128xf32>
    %c0_5 = arith.constant 0 : index
    %c0_6 = arith.constant 0 : index
    %30 = vector.load %arg4[%c0_5, %c0_6] : memref<128x128xf32, #tpu.memory_space<vmem>>, vector<128x128xf32>
    %cst_7 = arith.constant dense<0.000000e+00> : vector<4x128xf32>
    %31 = tpu.matmul %29, %30, %cst_7 {dimension_numbers = #tpu.dot_dimension_numbers<[1], [0], [0], [1], [0, 0, 1, 1], [], []>} : vector<4x128xf32>, vector<128x128xf32>, vector<4x128xf32> -> vector<4x128xf32>
    %32 = vector.extract_strided_slice %31 {offsets = [0, 0], sizes = [1, 128], strides = [1, 1]} : vector<4x128xf32> to vector<1x128xf32>
    %33 = vector.extract_strided_slice %31 {offsets = [1, 0], sizes = [1, 128], strides = [1, 1]} : vector<4x128xf32> to vector<1x128xf32>
    %c0_8 = arith.constant 0 : index
    %c0_9 = arith.constant 0 : index
    %34 = vector.load %arg3[%c0_8, %c0_9] : memref<6x128xf32, #tpu.memory_space<vmem>>, vector<1x128xf32>
    %c1 = arith.constant 1 : index
    %c0_10 = arith.constant 0 : index
    %35 = vector.load %arg3[%c1, %c0_10] : memref<6x128xf32, #tpu.memory_space<vmem>>, vector<1x128xf32>
    %36 = arith.mulf %32, %32 : vector<1x128xf32>
    %37 = arith.subf %33, %36 : vector<1x128xf32>
    %cst_11 = arith.constant 9.99999974E-6 : f32
    %38 = vector.broadcast %cst_11 : f32 to vector<1x128xf32>
    %39 = arith.addf %37, %38 : vector<1x128xf32>
    %40 = math.rsqrt %39 : vector<1x128xf32>
    %41 = arith.mulf %34, %40 : vector<1x128xf32>
    %42 = arith.mulf %32, %41 : vector<1x128xf32>
    %43 = arith.subf %35, %42 : vector<1x128xf32>
    %44 = vector.extract_strided_slice %31 {offsets = [2, 0], sizes = [1, 128], strides = [1, 1]} : vector<4x128xf32> to vector<1x128xf32>
    %45 = vector.extract_strided_slice %31 {offsets = [3, 0], sizes = [1, 128], strides = [1, 1]} : vector<4x128xf32> to vector<1x128xf32>
    %c2 = arith.constant 2 : index
    %c0_12 = arith.constant 0 : index
    %46 = vector.load %arg3[%c2, %c0_12] : memref<6x128xf32, #tpu.memory_space<vmem>>, vector<1x128xf32>
    %c3 = arith.constant 3 : index
    %c0_13 = arith.constant 0 : index
    %47 = vector.load %arg3[%c3, %c0_13] : memref<6x128xf32, #tpu.memory_space<vmem>>, vector<1x128xf32>
    %48 = arith.mulf %44, %44 : vector<1x128xf32>
    %49 = arith.subf %45, %48 : vector<1x128xf32>
    %cst_14 = arith.constant 9.99999974E-6 : f32
    %50 = vector.broadcast %cst_14 : f32 to vector<1x128xf32>
    %51 = arith.addf %49, %50 : vector<1x128xf32>
    %52 = math.rsqrt %51 : vector<1x128xf32>
    %53 = arith.mulf %46, %52 : vector<1x128xf32>
    %54 = arith.mulf %44, %53 : vector<1x128xf32>
    %55 = arith.subf %47, %54 : vector<1x128xf32>
    %56 = vector.extract_strided_slice %2 {offsets = [0, 0], sizes = [32, 128], strides = [1, 1]} : vector<32x256xf32> to vector<32x128xf32>
    %57 = vector.broadcast %41 : vector<1x128xf32> to vector<32x128xf32>
    %58 = arith.mulf %56, %57 : vector<32x128xf32>
    %59 = vector.broadcast %43 : vector<1x128xf32> to vector<32x128xf32>
    %60 = arith.addf %58, %59 : vector<32x128xf32>
    %cst_15 = arith.constant 0.000000e+00 : f32
    %61 = vector.broadcast %cst_15 : f32 to vector<32x128xf32>
    %62 = arith.maximumf %60, %61 : vector<32x128xf32>
    %63 = vector.extract_strided_slice %2 {offsets = [0, 128], sizes = [32, 128], strides = [1, 1]} : vector<32x256xf32> to vector<32x128xf32>
    %64 = vector.broadcast %53 : vector<1x128xf32> to vector<32x128xf32>
    %65 = arith.mulf %63, %64 : vector<32x128xf32>
    %66 = vector.broadcast %55 : vector<1x128xf32> to vector<32x128xf32>
    %67 = arith.addf %65, %66 : vector<32x128xf32>
    %c0_16 = arith.constant 0 : index
    %c0_17 = arith.constant 0 : index
    %68 = vector.load %arg2[%c0_16, %c0_17] : memref<128x384xf32, #tpu.memory_space<vmem>>, vector<128x384xf32>
    %cst_18 = arith.constant dense<0.000000e+00> : vector<32x384xf32>
    %69 = tpu.matmul %62, %68, %cst_18 {dimension_numbers = #tpu.dot_dimension_numbers<[1], [0], [0], [1], [0, 0, 1, 1], [], []>} : vector<32x128xf32>, vector<128x384xf32>, vector<32x384xf32> -> vector<32x384xf32>
    %c0_19 = arith.constant 0 : index
    %c0_20 = arith.constant 0 : index
    %c0_21 = arith.constant 0 : index
    %70 = vector.load %arg5[%c0_19, %c0_20, %c0_21] : memref<2x32x32xf32, #tpu.memory_space<vmem>>, vector<1x32x32xf32>
    %71 = vector.shape_cast %70 : vector<1x32x32xf32> to vector<32x32xf32>
    %72 = vector.extract_strided_slice %69 {offsets = [0, 0], sizes = [32, 128], strides = [1, 1]} : vector<32x384xf32> to vector<32x128xf32>
    %cst_22 = arith.constant dense<0.000000e+00> : vector<32x128xf32>
    %73 = tpu.matmul %71, %72, %cst_22 {dimension_numbers = #tpu.dot_dimension_numbers<[1], [0], [0], [1], [0, 0, 1, 1], [], []>} : vector<32x32xf32>, vector<32x128xf32>, vector<32x128xf32> -> vector<32x128xf32>
    %74 = vector.extract_strided_slice %69 {offsets = [0, 128], sizes = [32, 128], strides = [1, 1]} : vector<32x384xf32> to vector<32x128xf32>
    %75 = arith.addf %73, %74 : vector<32x128xf32>
    %c1_23 = arith.constant 1 : index
    %c0_24 = arith.constant 0 : index
    %c0_25 = arith.constant 0 : index
    %76 = vector.load %arg5[%c1_23, %c0_24, %c0_25] : memref<2x32x32xf32, #tpu.memory_space<vmem>>, vector<1x32x32xf32>
    %77 = vector.shape_cast %76 : vector<1x32x32xf32> to vector<32x32xf32>
    %78 = vector.extract_strided_slice %69 {offsets = [0, 256], sizes = [32, 128], strides = [1, 1]} : vector<32x384xf32> to vector<32x128xf32>
    %cst_26 = arith.constant dense<0.000000e+00> : vector<32x128xf32>
    %79 = tpu.matmul %77, %78, %cst_26 {dimension_numbers = #tpu.dot_dimension_numbers<[1], [0], [0], [1], [0, 0, 1, 1], [], []>} : vector<32x32xf32>, vector<32x128xf32>, vector<32x128xf32> -> vector<32x128xf32>
    %80 = arith.addf %75, %79 : vector<32x128xf32>
    %cst_27 = arith.constant dense<0.000000e+00> : vector<128xf32>
    %81 = vector.multi_reduction <add>, %80, %cst_27 [0] : vector<32x128xf32> to vector<128xf32>
    %82 = vector.shape_cast %81 : vector<128xf32> to vector<1x128xf32>
    %83 = arith.mulf %80, %80 : vector<32x128xf32>
    %cst_28 = arith.constant dense<0.000000e+00> : vector<128xf32>
    %84 = vector.multi_reduction <add>, %83, %cst_28 [0] : vector<32x128xf32> to vector<128xf32>
    %85 = vector.shape_cast %84 : vector<128xf32> to vector<1x128xf32>
    %86 = tpu.iota {dimensions = array<i32: 0>} : vector<2x128xi32>
    %c1_i32_29 = arith.constant 1 : i32
    %87 = vector.broadcast %c1_i32_29 : i32 to vector<2x128xi32>
    %88 = arith.cmpi eq, %86, %87 : vector<2x128xi32>
    %89 = vector.shape_cast %85 : vector<1x128xf32> to vector<1x128xf32>
    %90 = vector.broadcast %89 : vector<1x128xf32> to vector<2x128xf32>
    %91 = vector.shape_cast %82 : vector<1x128xf32> to vector<1x128xf32>
    %92 = vector.broadcast %91 : vector<1x128xf32> to vector<2x128xf32>
    %93 = arith.select %88, %90, %92 : vector<2x128xi1>, vector<2x128xf32>
    %c0_30 = arith.constant 0 : index
    %c0_31 = arith.constant 0 : index
    %94 = vector.load %arg4[%c0_30, %c0_31] : memref<128x128xf32, #tpu.memory_space<vmem>>, vector<128x128xf32>
    %cst_32 = arith.constant dense<0.000000e+00> : vector<2x128xf32>
    %95 = tpu.matmul %93, %94, %cst_32 {dimension_numbers = #tpu.dot_dimension_numbers<[1], [0], [0], [1], [0, 0, 1, 1], [], []>} : vector<2x128xf32>, vector<128x128xf32>, vector<2x128xf32> -> vector<2x128xf32>
    %96 = vector.extract_strided_slice %95 {offsets = [0, 0], sizes = [1, 128], strides = [1, 1]} : vector<2x128xf32> to vector<1x128xf32>
    %97 = vector.extract_strided_slice %95 {offsets = [1, 0], sizes = [1, 128], strides = [1, 1]} : vector<2x128xf32> to vector<1x128xf32>
    %c4 = arith.constant 4 : index
    %c0_33 = arith.constant 0 : index
    %98 = vector.load %arg3[%c4, %c0_33] : memref<6x128xf32, #tpu.memory_space<vmem>>, vector<1x128xf32>
    %c5 = arith.constant 5 : index
    %c0_34 = arith.constant 0 : index
    %99 = vector.load %arg3[%c5, %c0_34] : memref<6x128xf32, #tpu.memory_space<vmem>>, vector<1x128xf32>
    %100 = arith.mulf %96, %96 : vector<1x128xf32>
    %101 = arith.subf %97, %100 : vector<1x128xf32>
    %cst_35 = arith.constant 9.99999974E-6 : f32
    %102 = vector.broadcast %cst_35 : f32 to vector<1x128xf32>
    %103 = arith.addf %101, %102 : vector<1x128xf32>
    %104 = math.rsqrt %103 : vector<1x128xf32>
    %105 = arith.mulf %98, %104 : vector<1x128xf32>
    %106 = arith.mulf %96, %105 : vector<1x128xf32>
    %107 = arith.subf %99, %106 : vector<1x128xf32>
    %108 = vector.broadcast %105 : vector<1x128xf32> to vector<32x128xf32>
    %109 = arith.mulf %80, %108 : vector<32x128xf32>
    %110 = vector.broadcast %107 : vector<1x128xf32> to vector<32x128xf32>
    %111 = arith.addf %109, %110 : vector<32x128xf32>
    %112 = arith.addf %111, %67 : vector<32x128xf32>
    %cst_36 = arith.constant 0.000000e+00 : f32
    %113 = vector.broadcast %cst_36 : f32 to vector<32x128xf32>
    %114 = arith.maximumf %112, %113 : vector<32x128xf32>
    %c0_37 = arith.constant 0 : index
    %c0_38 = arith.constant 0 : index
    %115 = vector.load %arg6[%c0_37, %c0_38] : memref<32x128xf32, #tpu.memory_space<vmem>>, vector<32x128xf32>
    tpu.vector_store %arg6[%c0_37, %c0_38], %114 {strides = array<i32>} : memref<32x128xf32, #tpu.memory_space<vmem>>, vector<32x128xf32>,
    return
  }
}

</mosaic_0001>

<bundles_post_ra>
// kernel: tile.6
= control target key start
LH: loop header
LB: loop body
LE: loop exit
PB: predicated region body
PF: predicated region fallthrough
CT: control target
= control target key end

     0   :  { %s28_s0 = inlined_call_operand.vmem [shape: f32[8], index: 0, kind: input, shape index: {}]   ;;  %s29_s1 = inlined_call_operand.vmem [shape: f32[16,8], index: 1, kind: output, shape index: {}]  }
   0x1   :  { %v4_v0 = vld [vmem:[%s28_s0] ss:$0 sm:$0xff] }
   0x2   :  { %5 = vst [vmem:[%s29_s1] sm:$0xff] %v4_v0  ;;  %8 = vst [vmem:[%s29_s1 + $0x8] sm:$0xff] %v4_v0 }

// kernel: tile.7
= control target key start
LH: loop header
LB: loop body
LE: loop exit
PB: predicated region body
PF: predicated region fallthrough
CT: control target
= control target key end

     0   :  { %s133_s10 = smov 120   ;;  %s134_s11 = smov 104   ;;  %vm3_vm0 = vcmask 64512   ;;  %vm9_vm1 = vcmask 1048512   ;;  %vm15_vm2 = vcmask 982912   ;;  %vm21_vm3 = vcmask 917312   ;;  %s209_s0 = inlined_call_operand.vmem [shape: f32[16,8], index: 0, kind: input, shape index: {}]   ;;  %s210_s1 = inlined_call_operand.vmem [shape: f32[1,128], index: 1, kind: output, shape index: {}]  }
   0x1   :  { %v103_v0 = vld [vmem:[%s209_s0 + $0xf] sm:$0x1]   ;;  %v105_v1 = vld [vmem:[%s209_s0 + $0xd] sm:$0x1]   ;;  %v104_v2 = vld [vmem:[%s209_s0 + $0xe] sm:$0x1]  }
   0x2   :  { %7 = vrot.lane.b32.xlu0 %v103_v0, %s133_s10  ;;  %19 = vrot.lane.b32.xlu1 %v105_v1, %s134_s11  ;;  %v106_v3 = vld [vmem:[%s209_s0 + $0xc] sm:$0x1]   ;;  %s135_s16 = smov 112   ;;  %s136_s17 = smov 96   ;;  %v107_v4 = vld [vmem:[%s209_s0 + $0xb] sm:$0x1]  }
   0x3   :  { %v108_v5 = vld [vmem:[%s209_s0 + $0xa] sm:$0x1]   ;;  %v2_v6 = vld [vmem:[%s209_s0] sm:$0x1]   ;;  %s137_s24 = smov 88   ;;  %s138_s25 = smov 80  }
   0x4   :  { %4 = vst.msk [vmem:[#allocation0] sm:$0x1] %vm3_vm0, %v2_v6   ;;  %v109_v7 = vld [vmem:[%s209_s0 + $0x9] sm:$0x1]   ;;  %v110_v8 = vld [vmem:[%s209_s0 + $0x8] sm:$0x1]  }
   0x5   :  { %s139_s30 = smov 72   ;;  %s140_s2 = smov 64   ;;  %v111_v9 = vld [vmem:[%s209_s0 + $0x7] sm:$0x1]   ;;  %v112_v10 = vld [vmem:[%s209_s0 + $0x6] sm:$0x1]  }
   0x6   :  { %13 = vrot.lane.b32.xlu0 %v104_v2, %s135_s16  ;;  %25 = vrot.lane.b32.xlu1 %v106_v3, %s136_s17  ;;  %s141_s7 = smov 56   ;;  %s142_s8 = smov 48   ;;  %v113_v11 = vld [vmem:[%s209_s0 + $0x5] sm:$0x1]   ;;  %v114_v12 = vld [vmem:[%s209_s0 + $0x4] sm:$0x1]  }
   0x7   :  { %s143_s13 = smov 40   ;;  %s144_s14 = smov 32   ;;  %v115_v13 = vld [vmem:[%s209_s0 + $0x3] sm:$0x1]   ;;  %v116_v14 = vld [vmem:[%s209_s0 + $0x2] sm:$0x1]  }
   0x8   :  { %s145_s19 = smov 24   ;;  %s146_s20 = smov 16   ;;  %v117_v15 = vld [vmem:[%s209_s0 + $0x1] sm:$0x1]   ;;  %vm27_vm4 = vcmask 851712   ;;  %vm33_vm5 = vcmask 786112  }
   0x9   :  { %s147_s0 = smov 8   ;;  %vm39_vm6 = vcmask 720512   ;;  %vm45_vm7 = vcmask 654912   ;;  %vm51_vm8 = vcmask 589312   ;;  %vm57_vm9 = vcmask 523712  }
   0xa   :  { %31 = vrot.lane.b32.xlu0 %v107_v4, %s137_s24  ;;  %37 = vrot.lane.b32.xlu1 %v108_v5, %s138_s25  ;;  %vm63_vm10 = vcmask 458112   ;;  %vm69_vm11 = vcmask 392512   ;;  %vm75_vm12 = vcmask 326912   ;;  %vm81_vm13 = vcmask 261312  }
   0xb   :  { %vm87_vm14 = vcmask 195712   ;;  %vm93_vm15 = vcmask 130112  }
   0xe   :  { %43 = vrot.lane.b32.xlu0 %v109_v7, %s139_s30  ;;  %49 = vrot.lane.b32.xlu1 %v110_v8, %s140_s2 }
  0x12   :  { %55 = vrot.lane.b32.xlu0 %v111_v9, %s141_s7  ;;  %61 = vrot.lane.b32.xlu1 %v112_v10, %s142_s8 }
  0x16   :  { %67 = vrot.lane.b32.xlu0 %v113_v11, %s143_s13  ;;  %73 = vrot.lane.b32.xlu1 %v114_v12, %s144_s14 }
  0x1a   :  { %79 = vrot.lane.b32.xlu0 %v115_v13, %s145_s19  ;;  %85 = vrot.lane.b32.xlu1 %v116_v14, %s146_s20 }
  0x1e   :  { %91 = vrot.lane.b32.xlu0 %v117_v15, %s147_s0 }
  0x74   :  { %v8_v16 = vpop.permute.xlu0 %7   ;;  %v20_v17 = vpop.permute.xlu1 %19  }
  0x75   :  { %10 = vst.msk [vmem:[#allocation0] sm:$0x1] %vm9_vm1, %v8_v16  }
  0x78   :  { %v14_v18 = vpop.permute.xlu0 %13   ;;  %v26_v19 = vpop.permute.xlu1 %25  }
  0x79   :  { %16 = vst.msk [vmem:[#allocation0] sm:$0x1] %vm15_vm2, %v14_v18  }
  0x7a   :  { %22 = vst.msk [vmem:[#allocation0] sm:$0x1] %vm21_vm3, %v20_v17  }
  0x7b   :  { %28 = vst.msk [vmem:[#allocation0] sm:$0x1] %vm27_vm4, %v26_v19  }
  0x7c   :  { %v32_v20 = vpop.permute.xlu0 %31   ;;  %v38_v21 = vpop.permute.xlu1 %37  }
  0x7d   :  { %34 = vst.msk [vmem:[#allocation0] sm:$0x1] %vm33_vm5, %v32_v20  }
  0x7e   :  { %40 = vst.msk [vmem:[#allocation0] sm:$0x1] %vm39_vm6, %v38_v21  }
  0x80   :  { %v44_v22 = vpop.permute.xlu0 %43   ;;  %v50_v23 = vpop.permute.xlu1 %49  }
  0x81   :  { %46 = vst.msk [vmem:[#allocation0] sm:$0x1] %vm45_vm7, %v44_v22  }
  0x82   :  { %52 = vst.msk [vmem:[#allocation0] sm:$0x1] %vm51_vm8, %v50_v23  }
  0x84   :  { %v56_v24 = vpop.permute.xlu0 %55   ;;  %v62_v25 = vpop.permute.xlu1 %61  }
  0x85   :  { %58 = vst.msk [vmem:[#allocation0] sm:$0x1] %vm57_vm9, %v56_v24  }
  0x86   :  { %64 = vst.msk [vmem:[#allocation0] sm:$0x1] %vm63_vm10, %v62_v25  }
  0x88   :  { %v68_v26 = vpop.permute.xlu0 %67   ;;  %v74_v27 = vpop.permute.xlu1 %73  }
  0x89   :  { %70 = vst.msk [vmem:[#allocation0] sm:$0x1] %vm69_vm11, %v68_v26  }
  0x8a   :  { %76 = vst.msk [vmem:[#allocation0] sm:$0x1] %vm75_vm12, %v74_v27  }
  0x8c   :  { %v80_v28 = vpop.permute.xlu0 %79   ;;  %v86_v29 = vpop.permute.xlu1 %85  }
  0x8d   :  { %82 = vst.msk [vmem:[#allocation0] sm:$0x1] %vm81_vm13, %v80_v28  }
  0x8e   :  { %88 = vst.msk [vmem:[#allocation0] sm:$0x1] %vm87_vm14, %v86_v29  }
  0x90   :  { %v92_v30 = vpop.permute.xlu0 %91  }
  0x91   :  { %94 = vst.msk [vmem:[#allocation0] sm:$0x1] %vm93_vm15, %v92_v30  }
  0x98   :  { %v99_v31 = vld [vmem:[#allocation0] sm:$0x1] }
  0x99   :  { %102 = vst [vmem:[%s210_s1] sm:$0x1] %v99_v31 }

// kernel: residual_block_forward.1
= control target key start
LH: loop header
LB: loop body
LE: loop exit
PB: predicated region body
PF: predicated region fallthrough
CT: control target
= control target key end

     0   :  { %vm79_vm0 = vcmask 523264   ;;  %v1181_v56 = vmov 0.0   ;;  %vm1182_vm1 = vmmov 0   ;;  %vm609_vm5 = vcmask 261120   ;;  %s1826_s1 = inlined_call_operand.vmem [shape: f32[192,256], index: 1, kind: input, shape index: {}]   ;;  %s1827_s0 = inlined_call_operand.vmem [shape: f32[32,192], index: 0, kind: input, shape index: {}]   ;;  %s1828_s4 = inlined_call_operand.vmem [shape: f32[128,128], index: 4, kind: input, shape index: {}]   ;;  %s1829_s2 = inlined_call_operand.vmem [shape: f32[128,384], index: 2, kind: input, shape index: {}]   ;;  %s1830_s3 = inlined_call_operand.vmem [shape: f32[6,128], index: 3, kind: input, shape index: {}]   ;;  %s1831_s5 = inlined_call_operand.vmem [shape: f32[2,32,32], index: 5, kind: input, shape index: {}]   ;;  %s1832_s6 = inlined_call_operand.vmem [shape: f32[32,128], index: 6, kind: output, shape index: {}]  }
   0x1   :  { %v62_v0 = vld [vmem:[%s1826_s1 + $0xf8] sm:$0xff]  ;;  %v61_v1 = vld [vmem:[%s1826_s1 + $0xf0] sm:$0xff]  ;;  %v60_v2 = vld [vmem:[%s1826_s1 + $0xe8] sm:$0xff]  ;;  %1039 = vmatprep.subr.mxu1 %v1181_v56  ;;  %1071 = vmatprep.mubr.msk.f32.mxu1 %vm1182_vm1, %v1181_v56 }
   0x2   :  { %92 = vmatprep.subr.mxu0 %v62_v0  ;;  %v59_v3 = vld [vmem:[%s1826_s1 + $0xe0] sm:$0xff]  ;;  %v58_v4 = vld [vmem:[%s1826_s1 + $0xd8] sm:$0xff]  ;;  %v57_v5 = vld [vmem:[%s1826_s1 + $0xd0] sm:$0xff] }
   0x3   :  { %93 = vmatpush1.msra.mxu0 %v61_v1  ;;  %v56_v6 = vld [vmem:[%s1826_s1 + $0xc8] sm:$0xff]  ;;  %v55_v7 = vld [vmem:[%s1826_s1 + $0xc0] sm:$0xff]  ;;  %v54_v8 = vld [vmem:[%s1826_s1 + $0xb8] sm:$0xff] }
   0x4   :  { %94 = vmatprep.subr.mxu0 %v60_v2  ;;  %v53_v9 = vld [vmem:[%s1826_s1 + $0xb0] sm:$0xff]  ;;  %v52_v10 = vld [vmem:[%s1826_s1 + $0xa8] sm:$0xff]  ;;  %v51_v11 = vld [vmem:[%s1826_s1 + $0xa0] sm:$0xff] }
   0x5   :  { %95 = vmatpush1.msra.mxu0 %v59_v3  ;;  %v50_v12 = vld [vmem:[%s1826_s1 + $0x98] sm:$0xff]  ;;  %v49_v13 = vld [vmem:[%s1826_s1 + $0x90] sm:$0xff]  ;;  %v48_v14 = vld [vmem:[%s1826_s1 + $0x88] sm:$0xff] }
   0x6   :  { %96 = vmatprep.subr.mxu0 %v58_v4  ;;  %v47_v15 = vld [vmem:[%s1826_s1 + $0x80] sm:$0xff]  ;;  %v46_v16 = vld [vmem:[%s1826_s1 + $0x78] sm:$0xff]  ;;  %v45_v17 = vld [vmem:[%s1826_s1 + $0x70] sm:$0xff] }
   0x7   :  { %97 = vmatpush1.msra.mxu0 %v57_v5  ;;  %v44_v18 = vld [vmem:[%s1826_s1 + $0x68] sm:$0xff]  ;;  %v43_v20 = vld [vmem:[%s1826_s1 + $0x60] sm:$0xff]  ;;  %v42_v21 = vld [vmem:[%s1826_s1 + $0x58] sm:$0xff] }
   0x8   :  { %98 = vmatprep.subr.mxu0 %v56_v6  ;;  %v24_v19 = vld [vmem:[%s1827_s0 + $0x8] sm:$0xff]  ;;  %v41_v22 = vld [vmem:[%s1826_s1 + $0x50] sm:$0xff]  ;;  %v39_v24 = vld [vmem:[%s1826_s1 + $0x40] sm:$0xff] }
   0x9   :  { %99 = vmatpush1.msra.mxu0 %v55_v7  ;;  %953 = vmatprep.mubr.msk.f32.mxu0 %vm79_vm0, %v24_v19  ;;  %v40_v23 = vld [vmem:[%s1826_s1 + $0x48] sm:$0xff]  ;;  %v38_v25 = vld [vmem:[%s1826_s1 + $0x38] sm:$0xff]  ;;  %v37_v26 = vld [vmem:[%s1826_s1 + $0x30] sm:$0xff] }
   0xa   :  { %100 = vmatprep.subr.mxu0 %v54_v8  ;;  %v36_v27 = vld [vmem:[%s1826_s1 + $0x28] sm:$0xff]  ;;  %v35_v28 = vld [vmem:[%s1826_s1 + $0x20] sm:$0xff]  ;;  %v34_v29 = vld [vmem:[%s1826_s1 + $0x18] sm:$0xff] }
   0xb   :  { %101 = vmatpush1.msra.mxu0 %v53_v9  ;;  %v33_v30 = vld [vmem:[%s1826_s1 + $0x10] sm:$0xff]  ;;  %v32_v31 = vld [vmem:[%s1826_s1 + $0x8] sm:$0xff]  ;;  %v31_v32 = vld [vmem:[%s1826_s1] sm:$0xff] }
   0xc   :  { %102 = vmatprep.subr.mxu0 %v52_v10  ;;  %v78_v33 = vld [vmem:[%s1826_s1 + $0x178] sm:$0xff]  ;;  %v77_v34 = vld [vmem:[%s1826_s1 + $0x170] sm:$0xff]  ;;  %v76_v35 = vld [vmem:[%s1826_s1 + $0x168] sm:$0xff] }
   0xd   :  { %103 = vmatpush1.msra.mxu0 %v51_v11  ;;  %v75_v36 = vld [vmem:[%s1826_s1 + $0x160] sm:$0xff]  ;;  %v74_v37 = vld [vmem:[%s1826_s1 + $0x158] sm:$0xff]  ;;  %v73_v38 = vld [vmem:[%s1826_s1 + $0x150] sm:$0xff] }
   0xe   :  { %104 = vmatprep.subr.mxu0 %v50_v12  ;;  %v72_v39 = vld [vmem:[%s1826_s1 + $0x148] sm:$0xff]  ;;  %v71_v40 = vld [vmem:[%s1826_s1 + $0x140] sm:$0xff]  ;;  %v70_v41 = vld [vmem:[%s1826_s1 + $0x138] sm:$0xff] }
   0xf   :  { %105 = vmatpush1.msra.mxu0 %v49_v13  ;;  %v69_v42 = vld [vmem:[%s1826_s1 + $0x130] sm:$0xff]  ;;  %v68_v43 = vld [vmem:[%s1826_s1 + $0x128] sm:$0xff]  ;;  %v67_v44 = vld [vmem:[%s1826_s1 + $0x120] sm:$0xff] }
  0x10   :  { %106 = vmatprep.subr.mxu0 %v48_v14  ;;  %v66_v45 = vld [vmem:[%s1826_s1 + $0x118] sm:$0xff]  ;;  %v65_v46 = vld [vmem:[%s1826_s1 + $0x110] sm:$0xff]  ;;  %v64_v47 = vld [vmem:[%s1826_s1 + $0x108] sm:$0xff] }
  0x11   :  { %107 = vmatpush1.msra.mxu0 %v47_v15  ;;  %v63_v48 = vld [vmem:[%s1826_s1 + $0x100] sm:$0xff]  ;;  %v26_v50 = vld [vmem:[%s1827_s0 + $0x18] sm:$0xff]  ;;  %v25_v51 = vld [vmem:[%s1827_s0 + $0x10] sm:$0xff] }
  0x12   :  { %108 = vmatprep.subr.mxu0 %v46_v16  ;;  %v23_v49 = vld [vmem:[%s1827_s0] sm:$0xff]  ;;  %v28_v52 = vld [vmem:[%s1827_s0 + $0x28] sm:$0xff]  ;;  %v30_v54 = vld [vmem:[%s1827_s0 + $0x38] sm:$0xff] }
  0x13   :  { %109 = vmatpush1.msra.mxu0 %v45_v17  ;;  %v27_v53 = vld [vmem:[%s1827_s0 + $0x20] sm:$0xff]  ;;  %v29_v55 = vld [vmem:[%s1827_s0 + $0x30] sm:$0xff]  ;;  %v1394_v57 = vld [vmem:[%s1828_s4 + $0x78] sm:$0xff] }
  0x14   :  { %110 = vmatprep.subr.mxu0 %v44_v18  ;;  %1040 = vmatpush3.msra.mxu1 %v1394_v57  ;;  %v1401_v58 = vld [vmem:[%s1828_s4 + $0x70] sm:$0xff]  ;;  %v1408_v59 = vld [vmem:[%s1828_s4 + $0x68] sm:$0xff]  ;;  %v1415_v60 = vld [vmem:[%s1828_s4 + $0x60] sm:$0xff] }
  0x15   :  { %111 = vmatpush1.msra.mxu0 %v43_v20  ;;  %1041 = vmatprep.subr.mxu1 %v1181_v56  ;;  %v1422_v61 = vld [vmem:[%s1828_s4 + $0x58] sm:$0xff]  ;;  %v1429_v62 = vld [vmem:[%s1828_s4 + $0x50] sm:$0xff]  ;;  %v1436_v63 = vld [vmem:[%s1828_s4 + $0x48] sm:$0xff] }
  0x16   :  { %112 = vmatprep.subr.mxu0 %v42_v21  ;;  %1042 = vmatpush3.msra.mxu1 %v1401_v58  ;;  %v1443_v0 = vld [vmem:[%s1828_s4 + $0x40] sm:$0xff]  ;;  %v1450_v1 = vld [vmem:[%s1828_s4 + $0x38] sm:$0xff]  ;;  %v1457_v2 = vld [vmem:[%s1828_s4 + $0x30] sm:$0xff] }
  0x17   :  { %113 = vmatpush1.msra.mxu0 %v41_v22  ;;  %1043 = vmatprep.subr.mxu1 %v1181_v56  ;;  %v1464_v3 = vld [vmem:[%s1828_s4 + $0x28] sm:$0xff]  ;;  %v1471_v4 = vld [vmem:[%s1828_s4 + $0x20] sm:$0xff]  ;;  %v1478_v5 = vld [vmem:[%s1828_s4 + $0x18] sm:$0xff] }
  0x18   :  { %114 = vmatprep.subr.mxu0 %v40_v23  ;;  %1044 = vmatpush3.msra.mxu1 %v1408_v59  ;;  %v1484_v6 = vld [vmem:[%s1828_s4 + $0x10] sm:$0xff]  ;;  %v1490_v7 = vld [vmem:[%s1828_s4 + $0x8] sm:$0xff]  ;;  %v1499_v8 = vld [vmem:[%s1828_s4] sm:$0xff] }
  0x19   :  { %115 = vmatpush1.msra.mxu0 %v39_v24  ;;  %1045 = vmatprep.subr.mxu1 %v1181_v56 }
  0x1a   :  { %116 = vmatprep.subr.mxu0 %v38_v25  ;;  %1046 = vmatpush3.msra.mxu1 %v1415_v60 }
  0x1b   :  { %117 = vmatpush1.msra.mxu0 %v37_v26  ;;  %1047 = vmatprep.subr.mxu1 %v1181_v56 }
  0x1c   :  { %118 = vmatprep.subr.mxu0 %v36_v27  ;;  %1048 = vmatpush3.msra.mxu1 %v1422_v61 }
  0x1d   :  { %119 = vmatpush1.msra.mxu0 %v35_v28  ;;  %1049 = vmatprep.subr.mxu1 %v1181_v56 }
  0x1e   :  { %120 = vmatprep.subr.mxu0 %v34_v29  ;;  %1050 = vmatpush3.msra.mxu1 %v1429_v62 }
  0x1f   :  { %121 = vmatpush1.msra.mxu0 %v33_v30  ;;  %1051 = vmatprep.subr.mxu1 %v1181_v56 }
  0x20   :  { %122 = vmatprep.subr.mxu0 %v32_v31  ;;  %1052 = vmatpush3.msra.mxu1 %v1436_v63 }
  0x21   :  { %123 = vmatpush1.msra.mxu0 %v31_v32  ;;  %1053 = vmatprep.subr.mxu1 %v1181_v56 }
  0x22   :  { %140 = vmatprep.subr.mxu0 %v78_v33  ;;  %1054 = vmatpush3.msra.mxu1 %v1443_v0 }
  0x23   :  { %141 = vmatpush2.msra.mxu0 %v77_v34  ;;  %1055 = vmatprep.subr.mxu1 %v1181_v56 }
  0x24   :  { %142 = vmatprep.subr.mxu0 %v76_v35  ;;  %1056 = vmatpush3.msra.mxu1 %v1450_v1 }
  0x25   :  { %143 = vmatpush2.msra.mxu0 %v75_v36  ;;  %1057 = vmatprep.subr.mxu1 %v1181_v56 }
  0x26   :  { %144 = vmatprep.subr.mxu0 %v74_v37  ;;  %1058 = vmatpush3.msra.mxu1 %v1457_v2 }
  0x27   :  { %145 = vmatpush2.msra.mxu0 %v73_v38  ;;  %1059 = vmatprep.subr.mxu1 %v1181_v56 }
  0x28   :  { %146 = vmatprep.subr.mxu0 %v72_v39  ;;  %1060 = vmatpush3.msra.mxu1 %v1464_v3 }
  0x29   :  { %147 = vmatpush2.msra.mxu0 %v71_v40  ;;  %1061 = vmatprep.subr.mxu1 %v1181_v56 }
  0x2a   :  { %148 = vmatprep.subr.mxu0 %v70_v41  ;;  %1062 = vmatpush3.msra.mxu1 %v1471_v4  ;;  %v225_v41 = vlaneseq }
  0x2b   :  { %149 = vmatpush2.msra.mxu0 %v69_v42  ;;  %1063 = vmatprep.subr.mxu1 %v1181_v56 }
  0x2c   :  { %150 = vmatprep.subr.mxu0 %v68_v43  ;;  %1064 = vmatpush3.msra.mxu1 %v1478_v5 }
  0x2d   :  { %151 = vmatpush2.msra.mxu0 %v67_v44  ;;  %1065 = vmatprep.subr.mxu1 %v1181_v56 }
  0x2e   :  { %152 = vmatprep.subr.mxu0 %v66_v45  ;;  %1066 = vmatpush3.msra.mxu1 %v1484_v6 }
  0x2f   :  { %153 = vmatpush2.msra.mxu0 %v65_v46  ;;  %1067 = vmatprep.subr.mxu1 %v1181_v56 }
  0x30   :  { %154 = vmatprep.subr.mxu0 %v64_v47  ;;  %1068 = vmatpush3.msra.mxu1 %v1490_v7 }
  0x31   :  { %155 = vmatpush2.msra.mxu0 %v63_v48  ;;  %1069 = vmatprep.subr.mxu1 %v1181_v56 }
  0x32   :  { %157 = vmatmul.mubr.f32.vlgmr.msra.gmra.mxu0 %v23_v49  ;;  %1070 = vmatpush3.msra.mxu1 %v1499_v8 }
  0x33   :  { %954 = vmatprep.mubr.msk.f32.mxu0 %vm79_vm0, %v26_v50  ;;  %v1544_v50 = vshrl.u32 %v225_v41, 7  ;;  %v418_v41 = vld [vmem:[%s1829_s2 + $0x118] sm:$0xff] }
  0x35   :  { %vm227_vm2 = vcmp.eq.s32.totalorder %v1544_v50, 1  ;;  %vm229_vm3 = vcmp.eq.s32.totalorder %v1544_v50, 2  ;;  %vm231_vm4 = vcmp.eq.s32.totalorder %v1544_v50, 3 }
  0x36   :  { %163 = vmatmul.mubr.f32.gmra.mxu0 %v25_v51 }
  0x37   :  { %955 = vmatprep.mubr.msk.f32.mxu0 %vm79_vm0, %v28_v52 }
  0x3a   :  { %169 = vmatmul.mubr.f32.gmra.mxu0 %v27_v53 }
  0x3b   :  { %956 = vmatprep.mubr.msk.f32.mxu0 %vm79_vm0, %v30_v54 }
  0x3e   :  { %175 = vmatmul.mubr.f32.gmra.mxu0 %v29_v55 }
  0xf2   :  { %v1504_v9 = vpop.f32.mrf.mxu0 }
  0xf3   :  { %v199_v16 = vmul.f32 %v1504_v9, %v1504_v9 }
  0xf4   :  { %v1506_v10 = vpop.f32.mrf.mxu0 }
  0xf5   :  { %v200_v19 = vmul.f32 %v1506_v10, %v1506_v10 }
  0xf6   :  { %v1508_v11 = vpop.f32.mrf.mxu0 }
  0xf7   :  { %v201_v13 = vmul.f32 %v1508_v11, %v1508_v11  ;;  %v181_v17 = vadd.f32 %v1508_v11, %v1504_v9 }
  0xf8   :  { %v1510_v12 = vpop.f32.mrf.mxu0 }
  0xf9   :  { %v202_v14 = vmul.f32 %v1510_v12, %v1510_v12  ;;  %v207_v21 = vadd.f32 %v201_v13, %v199_v16  ;;  %v190_v22 = vadd.f32 %v1510_v12, %v1506_v10 }
  0xfa   :  { %v1516_v15 = vpop.f32.mrf.mxu0 }
  0xfb   :  { %v203_v18 = vmul.f32 %v1516_v15, %v1516_v15  ;;  %v182_v23 = vadd.f32 %v181_v17, %v1516_v15  ;;  %v216_v25 = vadd.f32 %v202_v14, %v200_v19 }
  0xfc   :  { %v1526_v20 = vpop.f32.mrf.mxu0 }
  0xfd   :  { %v204_v24 = vmul.f32 %v1526_v20, %v1526_v20  ;;  %v208_v27 = vadd.f32 %v207_v21, %v203_v18  ;;  %v191_v28 = vadd.f32 %v190_v22, %v1526_v20 }
  0xfe   :  { %v1533_v26 = vpop.f32.mrf.mxu0 }
  0xff   :  { %v183_v29 = vadd.f32 %v182_v23, %v1533_v26  ;;  %v205_v30 = vmul.f32 %v1533_v26, %v1533_v26  ;;  %v217_v31 = vadd.f32 %v216_v25, %v204_v24  ;;  %v429_v25 = vld [vmem:[%s1829_s2 + $0x170] sm:$0xff] }
 0x100   :  { %v1539_v32 = vpop.f32.mrf.mxu0  ;;  %431 = vmatprep.subr.mxu1 %v429_v25  ;;  %v394_v25 = vld [vmem:[%s1829_s2 + $0x58] sm:$0xff] }
 0x101   :  { %v184_v33 = vrot.slane %v183_v29, 4  ;;  %v209_v34 = vadd.f32 %v208_v27, %v205_v30  ;;  %v192_v35 = vadd.f32 %v191_v28, %v1539_v32  ;;  %v206_v36 = vmul.f32 %v1539_v32, %v1539_v32  ;;  %v428_v27 = vld [vmem:[%s1829_s2 + $0x168] sm:$0xff]  ;;  %v430_v28 = vld [vmem:[%s1829_s2 + $0x178] sm:$0xff]  ;;  %v425_v30 = vld [vmem:[%s1829_s2 + $0x150] sm:$0xff] }
 0x102   :  { %1074 = vmatprep.subr.mxu0 %v430_v28 }
 0x103   :  { %v185_v37 = vadd.f32 %v184_v33, %v183_v29  ;;  %v210_v38 = vrot.slane %v209_v34, 4  ;;  %v193_v39 = vrot.slane %v192_v35, 4  ;;  %v218_v40 = vadd.f32 %v217_v31, %v206_v36  ;;  %v426_v29 = vld [vmem:[%s1829_s2 + $0x158] sm:$0xff]  ;;  %1075 = vmatpush3.msra.mxu0 %v430_v28  ;;  %v427_v31 = vld [vmem:[%s1829_s2 + $0x160] sm:$0xff]  ;;  %v420_v36 = vld [vmem:[%s1829_s2 + $0x128] sm:$0xff] }
 0x104   :  { %1076 = vmatprep.subr.mxu0 %v427_v31  ;;  %v423_v33 = vld [vmem:[%s1829_s2 + $0x140] sm:$0xff]  ;;  %v389_v28 = vld [vmem:[%s1829_s2 + $0x30] sm:$0xff] }
 0x105   :  { %v186_v42 = vrot.slane %v185_v37, 2  ;;  %v211_v43 = vadd.f32 %v210_v38, %v209_v34  ;;  %v194_v44 = vadd.f32 %v193_v39, %v192_v35  ;;  %v219_v45 = vrot.slane %v218_v40, 4  ;;  %1077 = vmatpush3.msra.mxu0 %v427_v31  ;;  %v422_v34 = vld [vmem:[%s1829_s2 + $0x138] sm:$0xff]  ;;  %v424_v35 = vld [vmem:[%s1829_s2 + $0x148] sm:$0xff]  ;;  %v421_v38 = vld [vmem:[%s1829_s2 + $0x130] sm:$0xff] }
 0x106   :  { %1078 = vmatprep.subr.mxu0 %v424_v35  ;;  %v417_v39 = vld [vmem:[%s1829_s2 + $0x110] sm:$0xff]  ;;  %v386_v31 = vld [vmem:[%s1829_s2 + $0x18] sm:$0xff] }
 0x107   :  { %v187_v46 = vadd.f32 %v186_v42, %v185_v37  ;;  %v212_v47 = vrot.slane %v211_v43, 2  ;;  %v195_v48 = vrot.slane %v194_v44, 2  ;;  %v220_v49 = vadd.f32 %v219_v45, %v218_v40  ;;  %1079 = vmatpush3.msra.mxu0 %v424_v35  ;;  %v419_v37 = vld [vmem:[%s1829_s2 + $0x120] sm:$0xff]  ;;  %v416_v40 = vld [vmem:[%s1829_s2 + $0x108] sm:$0xff]  ;;  %v414_v42 = vld [vmem:[%s1829_s2 + $0xf8] sm:$0xff] }
 0x108   :  { %1080 = vmatprep.subr.mxu0 %v421_v38  ;;  %v411_v45 = vld [vmem:[%s1829_s2 + $0xe0] sm:$0xff] }
 0x109   :  { %v188_v51 = vrot.slane %v187_v46, 1  ;;  %v213_v52 = vadd.f32 %v212_v47, %v211_v43  ;;  %v196_v53 = vadd.f32 %v195_v48, %v194_v44  ;;  %v221_v54 = vrot.slane %v220_v49, 2  ;;  %1081 = vmatpush3.msra.mxu0 %v421_v38  ;;  %v413_v43 = vld [vmem:[%s1829_s2 + $0xf0] sm:$0xff]  ;;  %v415_v44 = vld [vmem:[%s1829_s2 + $0x100] sm:$0xff]  ;;  %v412_v47 = vld [vmem:[%s1829_s2 + $0xe8] sm:$0xff] }
 0x10a   :  { %1082 = vmatprep.subr.mxu0 %v418_v41  ;;  %v408_v48 = vld [vmem:[%s1829_s2 + $0xc8] sm:$0xff]  ;;  %v383_v35 = vld [vmem:[%s1829_s2] sm:$0xff] }
 0x10b   :  { %v214_v55 = vrot.slane %v213_v52, 1  ;;  %v197_v13 = vrot.slane %v196_v53, 1  ;;  %v222_v14 = vadd.f32 %v221_v54, %v220_v49  ;;  %v189_v16 = vadd.f32 %v188_v51, %v187_v46  ;;  %1083 = vmatpush3.msra.mxu0 %v418_v41  ;;  %v410_v46 = vld [vmem:[%s1829_s2 + $0xd8] sm:$0xff]  ;;  %v407_v49 = vld [vmem:[%s1829_s2 + $0xc0] sm:$0xff]  ;;  %v409_v51 = vld [vmem:[%s1829_s2 + $0xd0] sm:$0xff] }
 0x10c   :  { %1084 = vmatprep.subr.mxu0 %v415_v44  ;;  %v406_v54 = vld [vmem:[%s1829_s2 + $0xb8] sm:$0xff] }
 0x10d   :  { %v198_v17 = vadd.f32 %v197_v13, %v196_v53  ;;  %v215_v18 = vadd.f32 %v214_v55, %v213_v52  ;;  %v223_v19 = vrot.slane %v222_v14, 1  ;;  %1085 = vmatpush3.msra.mxu0 %v415_v44  ;;  %v405_v52 = vld [vmem:[%s1829_s2 + $0xb0] sm:$0xff]  ;;  %v404_v53 = vld [vmem:[%s1829_s2 + $0xa8] sm:$0xff]  ;;  %v402_v55 = vld [vmem:[%s1829_s2 + $0x98] sm:$0xff] }
 0x10e   :  { %1086 = vmatprep.subr.mxu0 %v412_v47  ;;  %v401_v13 = vld [vmem:[%s1829_s2 + $0x90] sm:$0xff]  ;;  %v319_v44 = vld [vmem:[%s1830_s3] sm:$0x1] }
 0x10f   :  { %v224_v21 = vadd.f32 %v223_v19, %v222_v14  ;;  %v228_v22 = vsel %vm227_vm2, %v215_v18, %v189_v16  ;;  %1087 = vmatpush3.msra.mxu0 %v412_v47  ;;  %v403_v14 = vld [vmem:[%s1829_s2 + $0xa0] sm:$0xff]  ;;  %v400_v18 = vld [vmem:[%s1829_s2 + $0x88] sm:$0xff] }
 0x110   :  { %v230_v23 = vsel %vm229_vm3, %v198_v17, %v228_v22  ;;  %1088 = vmatprep.subr.mxu0 %v409_v51  ;;  %v399_v16 = vld [vmem:[%s1829_s2 + $0x80] sm:$0xff]  ;;  %v398_v17 = vld [vmem:[%s1829_s2 + $0x78] sm:$0xff]  ;;  %v396_v19 = vld [vmem:[%s1829_s2 + $0x68] sm:$0xff] }
 0x111   :  { %v232_v24 = vsel %vm231_vm4, %v224_v21, %v230_v23  ;;  %1089 = vmatpush3.msra.mxu0 %v409_v51  ;;  %v395_v21 = vld [vmem:[%s1829_s2 + $0x60] sm:$0xff]  ;;  %v397_v22 = vld [vmem:[%s1829_s2 + $0x70] sm:$0xff] }
 0x112   :  { %1072 = vmatmul.mubr.f32.vlgmr.msra.gmra.mxu1 %v232_v24  ;;  %1090 = vmatprep.subr.mxu0 %v406_v54  ;;  %v393_v23 = vld [vmem:[%s1829_s2 + $0x50] sm:$0xff]  ;;  %v392_v24 = vld [vmem:[%s1829_s2 + $0x48] sm:$0xff] }
 0x113   :  { %495 = vmatprep.mubr.f32.mxu1 %v1181_v56  ;;  %432 = vmatpush1.msra.mxu1 %v428_v27  ;;  %v390_v27 = vld [vmem:[%s1829_s2 + $0x38] sm:$0xff] }
 0x114   :  { %433 = vmatprep.subr.mxu1 %v426_v29  ;;  %1091 = vmatpush3.msra.mxu0 %v406_v54  ;;  %v391_v29 = vld [vmem:[%s1829_s2 + $0x40] sm:$0xff] }
 0x115   :  { %434 = vmatpush1.msra.mxu1 %v425_v30  ;;  %1092 = vmatprep.subr.mxu0 %v403_v14  ;;  %v387_v30 = vld [vmem:[%s1829_s2 + $0x20] sm:$0xff] }
 0x116   :  { %435 = vmatprep.subr.mxu1 %v423_v33  ;;  %1093 = vmatpush3.msra.mxu0 %v403_v14  ;;  %v388_v33 = vld [vmem:[%s1829_s2 + $0x28] sm:$0xff] }
 0x117   :  { %436 = vmatpush1.msra.mxu1 %v422_v34  ;;  %1094 = vmatprep.subr.mxu0 %v400_v18  ;;  %v384_v34 = vld [vmem:[%s1829_s2 + $0x8] sm:$0xff] }
 0x118   :  { %437 = vmatprep.subr.mxu1 %v420_v36  ;;  %1095 = vmatpush3.msra.mxu0 %v400_v18  ;;  %v385_v36 = vld [vmem:[%s1829_s2 + $0x10] sm:$0xff] }
 0x119   :  { %438 = vmatpush1.msra.mxu1 %v419_v37  ;;  %1096 = vmatprep.subr.mxu0 %v397_v22 }
 0x11a   :  { %439 = vmatprep.subr.mxu1 %v417_v39  ;;  %1097 = vmatpush3.msra.mxu0 %v397_v22 }
 0x11b   :  { %440 = vmatpush1.msra.mxu1 %v416_v40  ;;  %1098 = vmatprep.subr.mxu0 %v394_v25 }
 0x11c   :  { %441 = vmatprep.subr.mxu1 %v414_v42  ;;  %1099 = vmatpush3.msra.mxu0 %v394_v25 }
 0x11d   :  { %442 = vmatpush1.msra.mxu1 %v413_v43  ;;  %1100 = vmatprep.subr.mxu0 %v391_v29 }
 0x11e   :  { %443 = vmatprep.subr.mxu1 %v411_v45  ;;  %1101 = vmatpush3.msra.mxu0 %v391_v29  ;;  %v334_v45 = vld [vmem:[%s1830_s3 + $0x2] sm:$0x1] }
 0x11f   :  { %444 = vmatpush1.msra.mxu1 %v410_v46  ;;  %1102 = vmatprep.subr.mxu0 %v388_v33  ;;  %v1704_v46 = vsub.s32 0, %v1544_v50  ;;  %v907_v50 = vld [vmem:[%s1830_s3 + $0x5] sm:$0x1] }
 0x120   :  { %445 = vmatprep.subr.mxu1 %v408_v48  ;;  %1103 = vmatpush3.msra.mxu0 %v388_v33 }
 0x121   :  { %446 = vmatpush1.msra.mxu1 %v407_v49  ;;  %1104 = vmatprep.subr.mxu0 %v385_v36 }
 0x122   :  { %447 = vmatprep.subr.mxu1 %v405_v52  ;;  %1105 = vmatpush3.msra.mxu0 %v385_v36  ;;  %v320_v52 = vld [vmem:[%s1830_s3 + $0x1] sm:$0x1] }
 0x123   :  { %448 = vmatpush1.msra.mxu1 %v404_v53 }
 0x124   :  { %449 = vmatprep.subr.mxu1 %v402_v55 }
 0x125   :  { %450 = vmatpush1.msra.mxu1 %v401_v13 }
 0x126   :  { %451 = vmatprep.subr.mxu1 %v399_v16 }
 0x127   :  { %452 = vmatpush1.msra.mxu1 %v398_v17  ;;  %v335_v17 = vld [vmem:[%s1830_s3 + $0x3] sm:$0x1] }
 0x128   :  { %453 = vmatprep.subr.mxu1 %v396_v19 }
 0x129   :  { %454 = vmatpush1.msra.mxu1 %v395_v21 }
 0x12a   :  { %455 = vmatprep.subr.mxu1 %v393_v23 }
 0x12b   :  { %456 = vmatpush1.msra.mxu1 %v392_v24 }
 0x12c   :  { %457 = vmatprep.subr.mxu1 %v390_v27 }
 0x12d   :  { %458 = vmatpush1.msra.mxu1 %v389_v28 }
 0x12e   :  { %459 = vmatprep.subr.mxu1 %v387_v30 }
 0x12f   :  { %460 = vmatpush1.msra.mxu1 %v386_v31 }
 0x130   :  { %461 = vmatprep.subr.mxu1 %v384_v34 }
 0x131   :  { %462 = vmatpush1.msra.mxu1 %v383_v35 }
 0x132   :  { %1140 = vmatprep.subr.mxu1 %v1181_v56 }
 0x1d2   :  { %v315_v37 = vpop.f32.mrf.mxu1 }
 0x1d3   :  { %v321_v38 = vmul.f32 %v315_v37, %v315_v37 }
 0x1d4   :  { %v1073_v39 = vpop.f32.mrf.mxu1 }
 0x1d5   :  { %v323_v40 = vrot.slane %v321_v38, 7 }
 0x1d7   :  { %v325_v41 = vsub.f32 %v315_v37, %v323_v40 }
 0x1d9   :  { %v326_v42 = vadd.f32 1e-05, %v325_v41 }
 0x1db   :  { %1177 = vrsqrt.f32 %v326_v42 }
 0x1e8   :  { %v1178_v43 = vpop.eup %1177 }
 0x1e9   :  { %v329_v47 = vrot.slane %v1178_v43, 1  ;;  %v336_v48 = vrot.slane %v1178_v43, 3 }
 0x1eb   :  { %v331_v49 = vmul.f32 %v329_v47, %v319_v44  ;;  %v338_v51 = vmul.f32 %v336_v48, %v334_v45 }
 0x1ed   :  { %v332_v53 = vmul.f32 %v331_v49, %v315_v37  ;;  %v340_v54 = vrot.slane %v338_v51, 6  ;;  %v350_v55 = vrot.slane %v331_v49, %v1704_v46  ;;  %v370_v16 = vrot.slane %v338_v51, %v1704_v46 }
 0x1ef   :  { %v333_v13 = vsub.f32 %v320_v52, %v332_v53  ;;  %v342_v14 = vmul.f32 %v340_v54, %v315_v37  ;;  %v351_v21 = vmul.f32 %v350_v55, %v1504_v9  ;;  %v352_v22 = vmul.f32 %v350_v55, %v1508_v11 }
 0x1f0   :  { %v353_v23 = vmul.f32 %v350_v55, %v1516_v15  ;;  %v371_v25 = vmul.f32 %v370_v16, %v1506_v10  ;;  %v372_v29 = vmul.f32 %v370_v16, %v1510_v12  ;;  %v373_v30 = vmul.f32 %v370_v16, %v1526_v20 }
 0x1f1   :  { %v344_v18 = vrot.slane %v342_v14, 2  ;;  %v358_v19 = vrot.slane %v333_v13, %v1704_v46  ;;  %v354_v33 = vmul.f32 %v350_v55, %v1533_v26  ;;  %v374_v34 = vmul.f32 %v370_v16, %v1539_v32  ;;  %v963_v26 = vld [vmem:[%s1831_s5 + $0x30] sm:$0xff]  ;;  %v964_v32 = vld [vmem:[%s1831_s5 + $0x38] sm:$0xff] }
 0x1f3   :  { %v346_v24 = vsub.f32 %v335_v17, %v344_v18  ;;  %v359_v27 = vadd.f32 %v358_v19, %v351_v21  ;;  %v360_v28 = vadd.f32 %v358_v19, %v352_v22  ;;  %v361_v31 = vadd.f32 %v358_v19, %v353_v23 }
 0x1f4   :  { %v362_v36 = vadd.f32 %v358_v19, %v354_v33 }
 0x1f5   :  { %v378_v9 = vrot.slane %v346_v24, %v1704_v46  ;;  %v363_v35 = vmax.f32 %v359_v27, 0.0  ;;  %v364_v11 = vmax.f32 %v360_v28, 0.0  ;;  %v365_v12 = vmax.f32 %v361_v31, 0.0 }
 0x1f6   :  { %v366_v20 = vmax.f32 %v362_v36, 0.0 }
 0x1f7   :  { %v1724_v15 = vadd.f32 %v378_v9, %v371_v25  ;;  %v1726_v37 = vadd.f32 %v378_v9, %v372_v29  ;;  %v1728_v10 = vadd.f32 %v378_v9, %v373_v30  ;;  %v1730_v38 = vadd.f32 %v378_v9, %v374_v34  ;;  %496 = vmatmul.mubr.f32.vlgmr.msra.gmra.mxu1 %v363_v35 }
 0x1f8   :  { %1106 = vmatprep.mubr.f32.mxu0 %v363_v35  ;;  %501 = vmatprep.mubr.f32.mxu1 %v1181_v56 }
 0x1f9   :  { %1107 = vmatmul.mubr.f32.vlgmr.msra.gmra.mxu0 %v364_v11  ;;  %1141 = vmatpush3.msra.mxu1 %v1394_v57  ;;  %v605_v57 = vld [vmem:[%s1831_s5] sm:$0xff] }
 0x1fa   :  { %1109 = vmatprep.mubr.f32.mxu0 %v365_v12  ;;  %1142 = vmatprep.subr.mxu1 %v1181_v56 }
 0x1fb   :  { %502 = vmatmul.mubr.f32.gmra.mxu1 %v364_v11 }
 0x1fc   :  { %507 = vmatprep.mubr.f32.mxu1 %v1181_v56  ;;  %1143 = vmatpush3.msra.mxu1 %v1401_v58 }
 0x1fd   :  { %1110 = vmatmul.mubr.f32.gmra.mxu0 %v366_v20  ;;  %1144 = vmatprep.subr.mxu1 %v1181_v56 }
 0x1fe   :  { %1145 = vmatpush3.msra.mxu1 %v1408_v59  ;;  %1120 = vmatprep.mubr.msk.f32.mxu0 %vm609_vm5, %v605_v57 }
 0x1ff   :  { %508 = vmatmul.mubr.f32.gmra.mxu1 %v365_v12  ;;  %1146 = vmatprep.subr.mxu1 %v1181_v56 }
 0x200   :  { %513 = vmatprep.mubr.f32.mxu1 %v1181_v56  ;;  %1147 = vmatpush3.msra.mxu1 %v1415_v60 }
 0x201   :  { %1148 = vmatprep.subr.mxu1 %v1181_v56 }
 0x202   :  { %1149 = vmatpush3.msra.mxu1 %v1422_v61 }
 0x203   :  { %514 = vmatmul.mubr.f32.gmra.mxu1 %v366_v20  ;;  %1150 = vmatprep.subr.mxu1 %v1181_v56 }
 0x204   :  { %1151 = vmatpush3.msra.mxu1 %v1429_v62  ;;  %1172 = vmatprep.mubr.msk.f32.mxu1 %vm1182_vm1, %v1181_v56 }
 0x205   :  { %1152 = vmatprep.subr.mxu1 %v1181_v56 }
 0x206   :  { %1153 = vmatpush3.msra.mxu1 %v1436_v63 }
 0x207   :  { %1154 = vmatprep.subr.mxu1 %v1181_v56 }
 0x208   :  { %1155 = vmatpush3.msra.mxu1 %v1443_v0 }
 0x209   :  { %1156 = vmatprep.subr.mxu1 %v1181_v56 }
 0x20a   :  { %1157 = vmatpush3.msra.mxu1 %v1450_v1 }
 0x20b   :  { %1158 = vmatprep.subr.mxu1 %v1181_v56 }
 0x20c   :  { %1159 = vmatpush3.msra.mxu1 %v1457_v2 }
 0x20d   :  { %1160 = vmatprep.subr.mxu1 %v1181_v56 }
 0x20e   :  { %1161 = vmatpush3.msra.mxu1 %v1464_v3  ;;  %v606_v3 = vld [vmem:[%s1831_s5 + $0x8] sm:$0xff] }
 0x20f   :  { %1162 = vmatprep.subr.mxu1 %v1181_v56 }
 0x210   :  { %1163 = vmatpush3.msra.mxu1 %v1471_v4  ;;  %v607_v4 = vld [vmem:[%s1831_s5 + $0x10] sm:$0xff] }
 0x211   :  { %1164 = vmatprep.subr.mxu1 %v1181_v56 }
 0x212   :  { %1165 = vmatpush3.msra.mxu1 %v1478_v5 }
 0x213   :  { %1166 = vmatprep.subr.mxu1 %v1181_v56 }
 0x214   :  { %1167 = vmatpush3.msra.mxu1 %v1484_v6  ;;  %v608_v6 = vld [vmem:[%s1831_s5 + $0x18] sm:$0xff] }
 0x215   :  { %1168 = vmatprep.subr.mxu1 %v1181_v56 }
 0x216   :  { %1169 = vmatpush3.msra.mxu1 %v1490_v7  ;;  %v961_v7 = vld [vmem:[%s1831_s5 + $0x20] sm:$0xff] }
 0x217   :  { %1170 = vmatprep.subr.mxu1 %v1181_v56 }
 0x218   :  { %1171 = vmatpush3.msra.mxu1 %v1499_v8  ;;  %v962_v8 = vld [vmem:[%s1831_s5 + $0x28] sm:$0xff] }
 0x2b7   :  { %v497_v58 = vpop.f32.mrf.mxu1 }
 0x2b9   :  { %v499_v59 = vpop.f32.mrf.mxu1  ;;  %v1108_v63 = vpop.f32.mrf.mxu0 }
 0x2bb   :  { %v503_v60 = vpop.f32.mrf.mxu1  ;;  %v586_v2 = vpop.f32.mrf.mxu0 }
 0x2bd   :  { %v505_v61 = vpop.f32.mrf.mxu1  ;;  %v1111_v56 = vpop.f32.mrf.mxu0 }
 0x2bf   :  { %v509_v62 = vpop.f32.mrf.mxu1  ;;  %v596_v5 = vpop.f32.mrf.mxu0 }
 0x2c1   :  { %v511_v0 = vpop.f32.mrf.mxu1 }
 0x2c3   :  { %v515_v1 = vpop.f32.mrf.mxu1 }
 0x2c4   :  { %1112 = vmatprep.subr.mxu0 %v515_v1 }
 0x2c5   :  { %1113 = vmatpush3.msra.mxu0 %v515_v1  ;;  %v517_v51 = vpop.f32.mrf.mxu1  ;;  %v906_v1 = vld [vmem:[%s1830_s3 + $0x4] sm:$0x1] }
 0x2c6   :  { %1114 = vmatprep.subr.mxu0 %v509_v62 }
 0x2c7   :  { %1115 = vmatpush3.msra.mxu0 %v509_v62 }
 0x2c8   :  { %1116 = vmatprep.subr.mxu0 %v503_v60 }
 0x2c9   :  { %1117 = vmatpush3.msra.mxu0 %v503_v60 }
 0x2ca   :  { %1118 = vmatprep.subr.mxu0 %v497_v58 }
 0x2cb   :  { %1119 = vmatpush3.msra.mxu0 %v497_v58 }
 0x2cc   :  { %1121 = vmatmul.mubr.msk.f32.vlgmr.msra.gmra.mxu0 %vm609_vm5, %v606_v3  ;;  %1126 = vmatprep.subr.mxu0 %v1111_v56 }
 0x2cd   :  { %1127 = vmatpush3.msra.mxu0 %v1111_v56  ;;  %1123 = vmatprep.mubr.msk.f32.mxu0 %vm609_vm5, %v607_v4 }
 0x2ce   :  { %1128 = vmatprep.subr.mxu0 %v596_v5 }
 0x2cf   :  { %1129 = vmatpush3.msra.mxu0 %v596_v5 }
 0x2d0   :  { %1124 = vmatmul.mubr.msk.f32.gmra.mxu0 %vm609_vm5, %v608_v6  ;;  %1130 = vmatprep.subr.mxu0 %v1108_v63 }
 0x2d1   :  { %1131 = vmatpush3.msra.mxu0 %v1108_v63  ;;  %1134 = vmatprep.mubr.msk.f32.mxu0 %vm609_vm5, %v961_v7 }
 0x2d2   :  { %1132 = vmatprep.subr.mxu0 %v586_v2 }
 0x2d3   :  { %1133 = vmatpush3.msra.mxu0 %v586_v2 }
 0x2d4   :  { %1135 = vmatmul.mubr.msk.f32.vlgmr.msra.gmra.mxu0 %vm609_vm5, %v962_v8 }
 0x2d5   :  { %1137 = vmatprep.mubr.msk.f32.mxu0 %vm609_vm5, %v963_v26 }
 0x2d8   :  { %1138 = vmatmul.mubr.msk.f32.gmra.mxu0 %vm609_vm5, %v964_v32 }
 0x38c   :  { %v1122_v39 = vpop.f32.mrf.mxu0 }
 0x38d   :  { %v694_v44 = vadd.f32 %v1122_v39, %v505_v61 }
 0x38e   :  { %v688_v40 = vpop.f32.mrf.mxu0 }
 0x38f   :  { %v689_v45 = vadd.f32 %v688_v40, %v499_v59 }
 0x390   :  { %v1125_v41 = vpop.f32.mrf.mxu0 }
 0x391   :  { %v704_v53 = vadd.f32 %v1125_v41, %v517_v51 }
 0x392   :  { %v698_v42 = vpop.f32.mrf.mxu0 }
 0x393   :  { %v699_v54 = vadd.f32 %v698_v42, %v511_v0 }
 0x394   :  { %v1136_v43 = vpop.f32.mrf.mxu0 }
 0x395   :  { %v810_v48 = vadd.f32 %v1136_v43, %v694_v44 }
 0x396   :  { %v790_v47 = vpop.f32.mrf.mxu0 }
 0x397   :  { %v809_v49 = vadd.f32 %v790_v47, %v689_v45  ;;  %v823_v14 = vmul.f32 %v810_v48, %v810_v48 }
 0x398   :  { %v1139_v52 = vpop.f32.mrf.mxu0 }
 0x399   :  { %v822_v55 = vmul.f32 %v809_v49, %v809_v49  ;;  %v813_v16 = vadd.f32 %v810_v48, %v809_v49  ;;  %v812_v17 = vadd.f32 %v1139_v52, %v704_v53 }
 0x39a   :  { %v800_v13 = vpop.f32.mrf.mxu0 }
 0x39b   :  { %v811_v18 = vadd.f32 %v800_v13, %v699_v54  ;;  %v826_v19 = vadd.f32 %v823_v14, %v822_v55  ;;  %v825_v23 = vmul.f32 %v812_v17, %v812_v17 }
 0x39d   :  { %v814_v21 = vadd.f32 %v813_v16, %v811_v18  ;;  %v824_v22 = vmul.f32 %v811_v18, %v811_v18 }
 0x39f   :  { %v815_v24 = vadd.f32 %v814_v21, %v812_v17  ;;  %v827_v25 = vadd.f32 %v826_v19, %v824_v22 }
 0x3a1   :  { %v816_v27 = vrot.slane %v815_v24, 4  ;;  %v828_v28 = vadd.f32 %v827_v25, %v825_v23 }
 0x3a3   :  { %v817_v29 = vadd.f32 %v816_v27, %v815_v24  ;;  %v829_v30 = vrot.slane %v828_v28, 4 }
 0x3a5   :  { %v818_v31 = vrot.slane %v817_v29, 2  ;;  %v830_v33 = vadd.f32 %v829_v30, %v828_v28 }
 0x3a7   :  { %v819_v34 = vadd.f32 %v818_v31, %v817_v29  ;;  %v831_v9 = vrot.slane %v830_v33, 2 }
 0x3a9   :  { %v820_v35 = vrot.slane %v819_v34, 1  ;;  %v832_v11 = vadd.f32 %v831_v9, %v830_v33 }
 0x3ab   :  { %v833_v36 = vrot.slane %v832_v11, 1  ;;  %v821_v12 = vadd.f32 %v820_v35, %v819_v34 }
 0x3ad   :  { %v834_v20 = vadd.f32 %v833_v36, %v832_v11 }
 0x3af   :  { %v835_v57 = vsel %vm227_vm2, %v834_v20, %v821_v12 }
 0x3b0   :  { %1173 = vmatmul.mubr.f32.vlgmr.msra.gmra.mxu1 %v835_v57 }
 0x470   :  { %v902_v58 = vpop.f32.mrf.mxu1 }
 0x471   :  { %v908_v59 = vmul.f32 %v902_v58, %v902_v58 }
 0x472   :  { %v1174_v60 = vpop.f32.mrf.mxu1 }
 0x473   :  { %v910_v61 = vrot.slane %v908_v59, 7 }
 0x475   :  { %v912_v62 = vsub.f32 %v902_v58, %v910_v61 }
 0x477   :  { %v913_v63 = vadd.f32 1e-05, %v912_v62 }
 0x479   :  { %1179 = vrsqrt.f32 %v913_v63 }
 0x486   :  { %v1180_v0 = vpop.eup %1179 }
 0x487   :  { %v916_v2 = vrot.slane %v1180_v0, 1 }
 0x489   :  { %v918_v56 = vmul.f32 %v916_v2, %v906_v1 }
 0x48b   :  { %v919_v3 = vmul.f32 %v918_v56, %v902_v58  ;;  %v924_v4 = vrot.slane %v918_v56, %v1704_v46 }
 0x48d   :  { %v920_v5 = vsub.f32 %v907_v50, %v919_v3  ;;  %v925_v6 = vmul.f32 %v924_v4, %v809_v49  ;;  %v926_v7 = vmul.f32 %v924_v4, %v810_v48  ;;  %v927_v8 = vmul.f32 %v924_v4, %v811_v18 }
 0x48e   :  { %v928_v26 = vmul.f32 %v924_v4, %v812_v17 }
 0x48f   :  { %v932_v32 = vrot.slane %v920_v5, %v1704_v46 }
 0x491   :  { %v933_v39 = vadd.f32 %v932_v32, %v925_v6  ;;  %v934_v40 = vadd.f32 %v932_v32, %v926_v7  ;;  %v935_v41 = vadd.f32 %v932_v32, %v927_v8  ;;  %v936_v42 = vadd.f32 %v932_v32, %v928_v26 }
 0x493   :  { %v937_v43 = vadd.f32 %v933_v39, %v1724_v15  ;;  %v938_v44 = vadd.f32 %v934_v40, %v1726_v37  ;;  %v939_v45 = vadd.f32 %v935_v41, %v1728_v10  ;;  %v940_v47 = vadd.f32 %v936_v42, %v1730_v38 }
 0x495   :  { %v941_v51 = vmax.f32 %v937_v43, 0.0  ;;  %v942_v52 = vmax.f32 %v938_v44, 0.0  ;;  %v943_v49 = vmax.f32 %v939_v45, 0.0  ;;  %v944_v48 = vmax.f32 %v940_v47, 0.0 }
 0x497   :  { %945 = vst [vmem:[%s1832_s6] sm:$0xff] %v941_v51  ;;  %946 = vst [vmem:[%s1832_s6 + $0x8] sm:$0xff] %v942_v52 }
 0x498   :  { %947 = vst [vmem:[%s1832_s6 + $0x10] sm:$0xff] %v943_v49  ;;  %948 = vst [vmem:[%s1832_s6 + $0x18] sm:$0xff] %v944_v48 }

</bundles_post_ra>
